<compile_context>
chip_gen: v7x
topology: tpu7x:2x2x1
jax: 0.10.0
libtpu: 0.0.40
codegen_flags: <defaults>
</compile_context>

<pallas_src>
import functools

import jax
import jax.numpy as jnp
from jax.experimental import pallas as pl
from jax.experimental.pallas import tpu as pltpu

D_IN = 768      # input channels (already a multiple of 128)
D_A = 384       # 380 padded to 384
D_B = 128       # 80  padded to 128
D_OUT_PAD = 128  # 10 padded to 128
D_OUT = 10


def _round_up(n, m):
    return ((n + m - 1) // m) * m


def cnnhead_kernel(x_ref, wa_ref, ba_ref, wb_ref, bb_ref, wc_ref, bc_ref,
                   o_ref):
    # x: (TB, 768) f32 ; weights bf16 ; biases f32 (1, N)
    x = x_ref[...].astype(jnp.bfloat16)

    # folded conv1+conv2 -> (TB, 384) ; relu (maxpool/dropout are identity)
    h = jnp.dot(x, wa_ref[...], preferred_element_type=jnp.float32) + ba_ref[...]
    h = jnp.maximum(h, 0.0)

    # folded conv3+conv4 -> (TB, 128) ; relu
    h = jnp.dot(h.astype(jnp.bfloat16), wb_ref[...],
                preferred_element_type=jnp.float32) + bb_ref[...]
    h = jnp.maximum(h, 0.0)

    # fc1 -> (TB, 128)  (lanes >= 10 are exact zeros by construction)
    o_ref[...] = jnp.dot(h.astype(jnp.bfloat16), wc_ref[...],
                         preferred_element_type=jnp.float32) + bc_ref[...]


def prepare_params(params, weight_dtype=jnp.bfloat16):
    """One-time prep: center-tap slice, transpose, fold, zero-pad, cast.

    Call this once and reuse the result; it must NOT be on the per-call path.
    """
    (w1, b1), (w2, b2), (w3, b3), (w4, b4), (wf, bf) = params

    w1t = w1[:, :, 1, 1].T          # (768, 576)
    w2t = w2[:, :, 1, 1].T          # (576, 380)
    w3t = w3[:, :, 1, 1].T          # (380, 160)
    w4t = w4[:, :, 1, 1].T          # (160, 80)
    wft = wf.T                      # (80, 10)

    # Fold consecutive linear layers (exact algebra, done in f32).
    wA = w1t @ w2t                  # (768, 380)
    bA = b1 @ w2t + b2              # (380,)
    wB = w3t @ w4t                  # (380, 80)
    bB = b3 @ w4t + b4              # (80,)
    wC = wft                        # (80, 10)
    bC = bf                         # (10,)

    def pad2(w, k, n):
        return jnp.pad(w, ((0, k - w.shape[0]), (0, n - w.shape[1])))

    def pad1(b, n):
        return jnp.pad(b, (0, n - b.shape[0])).reshape(1, n)

    # Zero-padding is correct: padded bias lanes are 0, relu(0)=0, and the
    # corresponding padded weight rows/cols of the next layer are 0.
    wA_p = pad2(wA, D_IN, D_A).astype(weight_dtype)
    bA_p = pad1(bA, D_A).astype(jnp.float32)
    wB_p = pad2(wB, D_A, D_B).astype(weight_dtype)
    bB_p = pad1(bB, D_B).astype(jnp.float32)
    wC_p = pad2(wC, D_B, D_OUT_PAD).astype(weight_dtype)
    bC_p = pad1(bC, D_OUT_PAD).astype(jnp.float32)
    return (wA_p, bA_p, wB_p, bB_p, wC_p, bC_p)


@functools.partial(jax.jit, static_argnames=("tb",))
def cnnhead_forward(x, prepared, tb=None):
    """x: (B, 768) float32 ; prepared = prepare_params(params). Returns (B, 10)."""
    B = x.shape[0]
    if tb is None:
        # Small batch: single grid step (per-step overhead > compute at tiny B).
        # Large batch: 256-row tiles keep the 256x256 MXU fed and stay well
        # under the scoped VMEM limit with double-buffered input DMA.
        tb = 256 if B > 512 else _round_up(B, 8)
    B_pad = _round_up(max(B, tb), tb)
    if B_pad != B:
        x = jnp.pad(x, ((0, B_pad - B), (0, 0)))

    wA, bA, wB, bB, wC, bC = prepared
    grid = (B_pad // tb,)

    out = pl.pallas_call(
        cnnhead_kernel,
        out_shape=jax.ShapeDtypeStruct((B_pad, D_OUT_PAD), jnp.float32),
        grid_spec=pltpu.PrefetchScalarGridSpec(
            num_scalar_prefetch=0,
            grid=grid,
            in_specs=[
                pl.BlockSpec((tb, D_IN), lambda i: (i, 0)),
                # Weights/biases: constant index_map -> VMEM-resident across steps.
                pl.BlockSpec((D_IN, D_A), lambda i: (0, 0)),
                pl.BlockSpec((1, D_A), lambda i: (0, 0)),
                pl.BlockSpec((D_A, D_B), lambda i: (0, 0)),
                pl.BlockSpec((1, D_B), lambda i: (0, 0)),
                pl.BlockSpec((D_B, D_OUT_PAD), lambda i: (0, 0)),
                pl.BlockSpec((1, D_OUT_PAD), lambda i: (0, 0)),
            ],
            out_specs=pl.BlockSpec((tb, D_OUT_PAD), lambda i: (i, 0)),
        ),
        compiler_params=pltpu.CompilerParams(
            dimension_semantics=("parallel",)),
    )(x, wA, bA, wB, bB, wC, bC)

    return out[:B, :D_OUT]


def init_params(key):
    """Deterministic synthetic parameters matching CNNHead.__init__ shapes."""
    dims = [(576, 768), (380, 576), (160, 380), (80, 160)]
    params = []
    keys = jax.random.split(key, 10)
    ki = 0
    for out_c, in_c in dims:
        w = jax.random.normal(keys[ki], (out_c, in_c, 3, 3), jnp.float32) * 0.02
        b = jax.random.normal(keys[ki + 1], (out_c,), jnp.float32) * 0.02
        params.append((w, b))
        ki += 2
    wf = jax.random.normal(keys[ki], (10, 80), jnp.float32) * 0.02
    bf = jax.random.normal(keys[ki + 1], (10,), jnp.float32) * 0.02
    params.append((wf, bf))
    return params


if __name__ == "__main__":
    key = jax.random.PRNGKey(0)
    k_x, k_p = jax.random.split(key)

    B = 2
    x = jax.random.normal(k_x, (B, D_IN), jnp.float32)   # module expects 768 channels
    params = init_params(k_p)

    # One-time weight preparation (hoisted out of the forward path).
    prepared = jax.tree_util.tree_map(jax.block_until_ready,
                                      prepare_params(params))

    out = cnnhead_forward(x, prepared)
    out = jax.block_until_ready(out)
    assert out.shape == (B, D_OUT), out.shape

    # Reference #1: replay the exact kernel math (folded/padded bf16 weights,
    # f32 accumulation) in plain JAX -> should match tightly.
    wA, bA, wB, bB, wC, bC = prepared
    h = jnp.dot(x.astype(jnp.bfloat16), wA,
                preferred_element_type=jnp.float32) + bA
    h = jnp.maximum(h, 0.0)
    h = jnp.dot(h.astype(jnp.bfloat16), wB,
                preferred_element_type=jnp.float32) + bB
    h = jnp.maximum(h, 0.0)
    ref_same = (jnp.dot(h.astype(jnp.bfloat16), wC,
                        preferred_element_type=jnp.float32) + bC)[:, :D_OUT]
    assert jnp.allclose(out, ref_same, atol=1e-3, rtol=1e-3), (
        float(jnp.max(jnp.abs(out - ref_same))))

    # Reference #2: full-precision PyTorch-equivalent math (unfolded, f32) —
    # sanity bound on the bf16 / folding error.
    (w1, b1), (w2, b2), (w3, b3), (w4, b4), (wf, bf) = params
    hf = x @ w1[:, :, 1, 1].T + b1
    hf = hf @ w2[:, :, 1, 1].T + b2
    hf = jnp.maximum(hf, 0.0)
    hf = hf @ w3[:, :, 1, 1].T + b3
    hf = hf @ w4[:, :, 1, 1].T + b4
    hf = jnp.maximum(hf, 0.0)
    ref_full = hf @ wf.T + bf
    assert float(jnp.max(jnp.abs(out - ref_full))) < 1e-2

    print("KERNEL_OK")
</pallas_src>

<mosaic_0001>
module attributes {stable_mosaic.version = 11 : i64} {
  func.func @cnnhead_kernel(%arg0: i32, %arg1: memref<8x768xf32, #tpu.memory_space<vmem>>, %arg2: memref<768x384xbf16, #tpu.memory_space<vmem>>, %arg3: memref<1x384xf32, #tpu.memory_space<vmem>>, %arg4: memref<384x128xbf16, #tpu.memory_space<vmem>>, %arg5: memref<1x128xf32, #tpu.memory_space<vmem>>, %arg6: memref<128x128xbf16, #tpu.memory_space<vmem>>, %arg7: memref<1x128xf32, #tpu.memory_space<vmem>>, %arg8: memref<8x128xf32, #tpu.memory_space<vmem>>) attributes {dimension_semantics = [#tpu.dimension_semantics<parallel>], iteration_bounds = array<i64: 1>, scalar_prefetch = 0 : i64, scratch_operands = 0 : i64, tpu.core_type = #tpu.core_type<tc>, window_params = [{transform_indices = @transform_0, window_bounds = array<i64: 8, 768>}, {pipeline_mode = #tpu.pipeline_mode<synchronous>, transform_indices = @transform_1, window_bounds = array<i64: 768, 384>}, {pipeline_mode = #tpu.pipeline_mode<synchronous>, transform_indices = @transform_2, window_bounds = array<i64: 1, 384>}, {pipeline_mode = #tpu.pipeline_mode<synchronous>, transform_indices = @transform_3, window_bounds = array<i64: 384, 128>}, {pipeline_mode = #tpu.pipeline_mode<synchronous>, transform_indices = @transform_4, window_bounds = array<i64: 1, 128>}, {pipeline_mode = #tpu.pipeline_mode<synchronous>, transform_indices = @transform_5, window_bounds = array<i64: 128, 128>}, {pipeline_mode = #tpu.pipeline_mode<synchronous>, transform_indices = @transform_6, window_bounds = array<i64: 1, 128>}, {transform_indices = @transform_7, window_bounds = array<i64: 8, 128>}]} {
    %c0 = arith.constant 0 : index
    %c0_0 = arith.constant 0 : index
    %0 = vector.load %arg1[%c0, %c0_0] : memref<8x768xf32, #tpu.memory_space<vmem>>, vector<8x768xf32>
    %1 = arith.truncf %0 : vector<8x768xf32> to vector<8x768xbf16>
    %c0_1 = arith.constant 0 : index
    %c0_2 = arith.constant 0 : index
    %2 = vector.load %arg2[%c0_1, %c0_2] : memref<768x384xbf16, #tpu.memory_space<vmem>>, vector<768x384xbf16>
    %cst = arith.constant dense<0.000000e+00> : vector<8x384xf32>
    %3 = tpu.matmul %1, %2, %cst {dimension_numbers = #tpu.dot_dimension_numbers<[1], [0], [0], [1], [0, 0, 1, 1], [], []>} : vector<8x768xbf16>, vector<768x384xbf16>, vector<8x384xf32> -> vector<8x384xf32>
    %c0_3 = arith.constant 0 : index
    %c0_4 = arith.constant 0 : index
    %4 = vector.load %arg3[%c0_3, %c0_4] : memref<1x384xf32, #tpu.memory_space<vmem>>, vector<1x384xf32>
    %5 = vector.broadcast %4 : vector<1x384xf32> to vector<8x384xf32>
    %6 = arith.addf %3, %5 : vector<8x384xf32>
    %cst_5 = arith.constant 0.000000e+00 : f32
    %7 = vector.broadcast %cst_5 : f32 to vector<8x384xf32>
    %8 = arith.maximumf %6, %7 : vector<8x384xf32>
    %9 = arith.truncf %8 : vector<8x384xf32> to vector<8x384xbf16>
    %c0_6 = arith.constant 0 : index
    %c0_7 = arith.constant 0 : index
    %10 = vector.load %arg4[%c0_6, %c0_7] : memref<384x128xbf16, #tpu.memory_space<vmem>>, vector<384x128xbf16>
    %cst_8 = arith.constant dense<0.000000e+00> : vector<8x128xf32>
    %11 = tpu.matmul %9, %10, %cst_8 {dimension_numbers = #tpu.dot_dimension_numbers<[1], [0], [0], [1], [0, 0, 1, 1], [], []>} : vector<8x384xbf16>, vector<384x128xbf16>, vector<8x128xf32> -> vector<8x128xf32>
    %c0_9 = arith.constant 0 : index
    %c0_10 = arith.constant 0 : index
    %12 = vector.load %arg5[%c0_9, %c0_10] : memref<1x128xf32, #tpu.memory_space<vmem>>, vector<1x128xf32>
    %13 = vector.broadcast %12 : vector<1x128xf32> to vector<8x128xf32>
    %14 = arith.addf %11, %13 : vector<8x128xf32>
    %cst_11 = arith.constant 0.000000e+00 : f32
    %15 = vector.broadcast %cst_11 : f32 to vector<8x128xf32>
    %16 = arith.maximumf %14, %15 : vector<8x128xf32>
    %17 = arith.truncf %16 : vector<8x128xf32> to vector<8x128xbf16>
    %c0_12 = arith.constant 0 : index
    %c0_13 = arith.constant 0 : index
    %18 = vector.load %arg6[%c0_12, %c0_13] : memref<128x128xbf16, #tpu.memory_space<vmem>>, vector<128x128xbf16>
    %cst_14 = arith.constant dense<0.000000e+00> : vector<8x128xf32>
    %19 = tpu.matmul %17, %18, %cst_14 {dimension_numbers = #tpu.dot_dimension_numbers<[1], [0], [0], [1], [0, 0, 1, 1], [], []>} : vector<8x128xbf16>, vector<128x128xbf16>, vector<8x128xf32> -> vector<8x128xf32>
    %c0_15 = arith.constant 0 : index
    %c0_16 = arith.constant 0 : index
    %20 = vector.load %arg7[%c0_15, %c0_16] : memref<1x128xf32, #tpu.memory_space<vmem>>, vector<1x128xf32>
    %21 = vector.broadcast %20 : vector<1x128xf32> to vector<8x128xf32>
    %22 = arith.addf %19, %21 : vector<8x128xf32>
    %c0_17 = arith.constant 0 : index
    %c0_18 = arith.constant 0 : index
    %23 = vector.load %arg8[%c0_17, %c0_18] : memref<8x128xf32, #tpu.memory_space<vmem>>, vector<8x128xf32>
    tpu.vector_store %arg8[%c0_17, %c0_18], %22 {strides = array<i32>} : memref<8x128xf32, #tpu.memory_space<vmem>>, vector<8x128xf32>,
    return
  }
  func.func @transform_0(%arg0: i32) -> (i32, i32) {
    %c0_i32 = arith.constant 0 : i32
    %c0_i32_0 = arith.constant 0 : i32
    return %arg0, %c0_i32 : i32, i32
  }
  func.func @transform_1(%arg0: i32) -> (i32, i32) {
    %c0_i32 = arith.constant 0 : i32
    %c0_i32_0 = arith.constant 0 : i32
    %c0_i32_1 = arith.constant 0 : i32
    return %c0_i32, %c0_i32_0 : i32, i32
  }
  func.func @transform_2(%arg0: i32) -> (i32, i32) {
    %c0_i32 = arith.constant 0 : i32
    %c0_i32_0 = arith.constant 0 : i32
    %c0_i32_1 = arith.constant 0 : i32
    return %c0_i32, %c0_i32_0 : i32, i32
  }
  func.func @transform_3(%arg0: i32) -> (i32, i32) {
    %c0_i32 = arith.constant 0 : i32
    %c0_i32_0 = arith.constant 0 : i32
    %c0_i32_1 = arith.constant 0 : i32
    return %c0_i32, %c0_i32_0 : i32, i32
  }
  func.func @transform_4(%arg0: i32) -> (i32, i32) {
    %c0_i32 = arith.constant 0 : i32
    %c0_i32_0 = arith.constant 0 : i32
    %c0_i32_1 = arith.constant 0 : i32
    return %c0_i32, %c0_i32_0 : i32, i32
  }
  func.func @transform_5(%arg0: i32) -> (i32, i32) {
    %c0_i32 = arith.constant 0 : i32
    %c0_i32_0 = arith.constant 0 : i32
    %c0_i32_1 = arith.constant 0 : i32
    return %c0_i32, %c0_i32_0 : i32, i32
  }
  func.func @transform_6(%arg0: i32) -> (i32, i32) {
    %c0_i32 = arith.constant 0 : i32
    %c0_i32_0 = arith.constant 0 : i32
    %c0_i32_1 = arith.constant 0 : i32
    return %c0_i32, %c0_i32_0 : i32, i32
  }
  func.func @transform_7(%arg0: i32) -> (i32, i32) {
    %c0_i32 = arith.constant 0 : i32
    %c0_i32_0 = arith.constant 0 : i32
    return %arg0, %c0_i32 : i32, i32
  }
}

</mosaic_0001>

<bundles_post_ra>
// kernel: cnnhead_forward.1
= control target key start
LH: loop header
LB: loop body
LE: loop exit
PB: predicated region body
PF: predicated region fallthrough
CT: control target
= control target key end

     0   :  { %12 = vsyncpa [#allocation3], 0  ;;  %s2460_s0 = inlined_call_operand.vmem [shape: f32[8,768], index: 0, kind: input, shape index: {}]   ;;  %s2461_s1 = inlined_call_operand.hbm [shape: bf16[768,384], index: 1, kind: input, shape index: {}]   ;;  %s2462_s2 = inlined_call_operand.vmem [shape: f32[1,384], index: 2, kind: input, shape index: {}]   ;;  %s2463_s3 = inlined_call_operand.hbm [shape: bf16[384,128], index: 3, kind: input, shape index: {}]   ;;  %s2464_s4 = inlined_call_operand.vmem [shape: f32[1,128], index: 4, kind: input, shape index: {}]   ;;  %s2465_s5 = inlined_call_operand.vmem [shape: bf16[128,128], index: 5, kind: input, shape index: {}]   ;;  %s2466_s6 = inlined_call_operand.vmem [shape: f32[1,128], index: 6, kind: input, shape index: {}]   ;;  %s2467_s7 = inlined_call_operand.vmem [shape: f32[8,128], index: 7, kind: output, shape index: {}]  }
   0x1   :  { %13 = vsyncpa [#allocation5], 0  ;;  %s2306_s24 = smov [#allocation2]   ;;  %s2258_s28 = scalar_lea.hbm %s2461_s1, 18432 }
   0x2   :  { %s21_s25 = sshll.u32 %s2306_s24, 4  ;;  %p2259_p0 = scmp.ne.s32.totalorder %s2461_s1, %s2258_s28  ;;  %s22_s25 = int_to_ptr.vmem [resolvable:$true] %s21_s25 }
   0x3   :  { %p2262_p1 = scmp.lt.u32.totalorder %s2258_s28, %s2461_s1 }
   0x5   :  { %p2264_p2 = pnand %p2262_p1, %p2259_p0 }
   0x7   :  { %2267 = shalt.err (!%p2264_p2)
}
   0x8   :  { %s2268_s10 = scalar_lea.vmem %s22_s25, 18432  ;;  %p2273_p4 = scmp.lt.s32.totalorder %s22_s25, %s22_s25 }
   0x9   :  { %p2269_p3 = scmp.ne.s32.totalorder %s22_s25, %s2268_s10  ;;  %p2274_p5 = scmp.lt.s32.totalorder %s2268_s10, %s2268_s10 }
   0xb   :  { %p2275_p6 = por %p2274_p5, %p2273_p4 }
   0xd   :  { %p2276_p7 = pnand %p2275_p6, %p2269_p3 }
   0xf   :  { %2279 = shalt.err (!%p2276_p7)
}
  0x10   :  { %s2307_s11 = smov 192   ;;  %s2308_s12 = smov 12  }
  0x11   :  { %27 = dma.hbm_to_vmem [thread:$0]  %s2461_s1, 18432, %s22_s25, [#allocation3], %s2307_s11, %s2307_s11, %s2308_s12  }
  0x12   :  { %s2309_s15 = smov [#allocation4]   ;;  %s2280_s19 = scalar_lea.hbm %s2463_s3, 3072 }
  0x13   :  { %s35_s16 = sshll.u32 %s2309_s15, 4  ;;  %p2281_p8 = scmp.ne.s32.totalorder %s2463_s3, %s2280_s19  ;;  %s36_s16 = int_to_ptr.vmem [resolvable:$true] %s35_s16 }
  0x14   :  { %p2284_p9 = scmp.lt.u32.totalorder %s2280_s19, %s2463_s3 }
  0x16   :  { %p2286_p10 = pnand %p2284_p9, %p2281_p8 }
  0x18   :  { %2289 = shalt.err (!%p2286_p10)
}
  0x19   :  { %s2290_s24 = scalar_lea.vmem %s36_s16, 3072  ;;  %p2295_p12 = scmp.lt.s32.totalorder %s36_s16, %s36_s16 }
  0x1a   :  { %p2291_p11 = scmp.ne.s32.totalorder %s36_s16, %s2290_s24  ;;  %p2296_p13 = scmp.lt.s32.totalorder %s2290_s24, %s2290_s24 }
  0x1c   :  { %p2297_p0 = por %p2296_p13, %p2295_p12 }
  0x1e   :  { %p2298_p1 = pnand %p2297_p0, %p2291_p11 }
  0x20   :  { %2301 = shalt.err (!%p2298_p1)
}
  0x21   :  { %s2310_s1 = smov 64   ;;  %s2311_s25 = smov 4  }
  0x22   :  { %41 = dma.hbm_to_vmem [thread:$0]  %s2463_s3, 3072, %s36_s16, [#allocation5], %s2310_s1, %s2310_s1, %s2311_s25  }
  0x23   :  { %2302 = dma.done.wait [#allocation3], 18432  }
  0x24   :  { %2303 = vsyncadd [#allocation3], 4294948864 }
  0x25   :  { %2304 = dma.done.wait [#allocation5], 3072  }
  0x26   :  { %2305 = vsyncadd [#allocation5], 4294964224  ;;  %v2034_v0 = vld [vmem:[#allocation2 + $0x4] ss:$12 sps:$4 sm:$0xff]   ;;  %v2036_v1 = vld [vmem:[#allocation2] ss:$12 sps:$4 sm:$0xff]  }
  0x27   :  { %1044 = vmatprep.subr.bf16.mxu0 %v2034_v0  ;;  %v2037_v2 = vld [vmem:[#allocation2 + $0x1c] ss:$12 sps:$4 sm:$0xff]   ;;  %v2039_v3 = vld [vmem:[#allocation2 + $0x18] ss:$12 sps:$4 sm:$0xff]   ;;  %v2040_v4 = vld [vmem:[#allocation2 + $0x34] ss:$12 sps:$4 sm:$0xff]  }
  0x28   :  { %1045 = vmatpush1.bf16.msra.mxu0 %v2036_v1  ;;  %v2042_v5 = vld [vmem:[#allocation2 + $0x30] ss:$12 sps:$4 sm:$0xff]   ;;  %v2043_v6 = vld [vmem:[#allocation2 + $0x4c] ss:$12 sps:$4 sm:$0xff]   ;;  %v2045_v7 = vld [vmem:[#allocation2 + $0x48] ss:$12 sps:$4 sm:$0xff]  }
  0x29   :  { %1046 = vmatprep.subr.bf16.mxu0 %v2037_v2  ;;  %v2046_v8 = vld [vmem:[#allocation2 + $0x64] ss:$12 sps:$4 sm:$0xff]   ;;  %v2048_v9 = vld [vmem:[#allocation2 + $0x60] ss:$12 sps:$4 sm:$0xff]   ;;  %v2049_v10 = vld [vmem:[#allocation2 + $0x7c] ss:$12 sps:$4 sm:$0xff]  }
  0x2a   :  { %v2051_v11 = vld [vmem:[#allocation2 + $0x78] ss:$12 sps:$4 sm:$0xff]   ;;  %v2052_v12 = vld [vmem:[#allocation2 + $0x94] ss:$12 sps:$4 sm:$0xff]   ;;  %v56_v13 = vld [vmem:[%s2460_s0 + $0x8] sm:$0xff]  ;;  %vm2313_vm0 = vmmov 0  }
  0x2b   :  { %v2054_v14 = vld [vmem:[#allocation2 + $0x90] ss:$12 sps:$4 sm:$0xff]   ;;  %v62_v15 = vpack.c.bf16 %v56_v13, %v56_v13  ;;  %v2055_v16 = vld [vmem:[#allocation2 + $0xac] ss:$12 sps:$4 sm:$0xff]   ;;  %v2085_v17 = vld [vmem:[#allocation2 + $0xc8] ss:$12 sps:$4 sm:$0xff]  }
  0x2c   :  { %1047 = vmatpush1.bf16.msra.mxu0 %v2039_v3  ;;  %v2086_v18 = vld [vmem:[#allocation2 + $0x8] ss:$12 sps:$4 sm:$0xff]   ;;  %v2058_v20 = vld [vmem:[#allocation2 + $0xc4] ss:$12 sps:$4 sm:$0xff]   ;;  %1870 = vmatprep.subr.bf16.mxu1 %v2085_v17  ;;  %v2090_v21 = vld [vmem:[#allocation2 + $0xe0] ss:$12 sps:$4 sm:$0xff]  }
  0x2d   :  { %1048 = vmatprep.subr.bf16.mxu0 %v2040_v4  ;;  %1076 = vmatprep.mubr.bf16.mxu0 %v62_v15  ;;  %v2057_v19 = vld [vmem:[#allocation2 + $0xa8] ss:$12 sps:$4 sm:$0xff]   ;;  %v2091_v22 = vld [vmem:[#allocation2 + $0x20] ss:$12 sps:$4 sm:$0xff]   ;;  %v2095_v24 = vld [vmem:[#allocation2 + $0xf8] ss:$12 sps:$4 sm:$0xff]  }
  0x2e   :  { %1199 = vmatprep.mubr.bf16.mxu1 %v62_v15  ;;  %1871 = vmatpush3.bf16.msra.mxu1 %v2086_v18  ;;  %v2060_v23 = vld [vmem:[#allocation2 + $0xc0] ss:$12 sps:$4 sm:$0xff]   ;;  %v2096_v25 = vld [vmem:[#allocation2 + $0x38] ss:$12 sps:$4 sm:$0xff]   ;;  %v2061_v26 = vld [vmem:[#allocation2 + $0xdc] ss:$12 sps:$4 sm:$0xff]  }
  0x2f   :  { %1872 = vmatprep.subr.bf16.mxu1 %v2090_v21  ;;  %v2063_v27 = vld [vmem:[#allocation2 + $0xd8] ss:$12 sps:$4 sm:$0xff]   ;;  %v2100_v28 = vld [vmem:[#allocation2 + $0x110] ss:$12 sps:$4 sm:$0xff]   ;;  %v2064_v30 = vld [vmem:[#allocation2 + $0xf4] ss:$12 sps:$4 sm:$0xff]  }
  0x30   :  { %1049 = vmatpush1.bf16.msra.mxu0 %v2042_v5  ;;  %v2101_v29 = vld [vmem:[#allocation2 + $0x50] ss:$12 sps:$4 sm:$0xff]   ;;  %v2105_v31 = vld [vmem:[#allocation2 + $0x128] ss:$12 sps:$4 sm:$0xff]   ;;  %v2067_v33 = vld [vmem:[#allocation2 + $0x10c] ss:$12 sps:$4 sm:$0xff]  }
  0x31   :  { %1050 = vmatprep.subr.bf16.mxu0 %v2043_v6  ;;  %v2066_v32 = vld [vmem:[#allocation2 + $0xf0] ss:$12 sps:$4 sm:$0xff]   ;;  %v2106_v34 = vld [vmem:[#allocation2 + $0x68] ss:$12 sps:$4 sm:$0xff]   ;;  %v2110_v35 = vld [vmem:[#allocation2 + $0x140] ss:$12 sps:$4 sm:$0xff]  }
  0x32   :  { %1873 = vmatpush3.bf16.msra.mxu1 %v2091_v22  ;;  %v2069_v36 = vld [vmem:[#allocation2 + $0x108] ss:$12 sps:$4 sm:$0xff]   ;;  %v2070_v37 = vld [vmem:[#allocation2 + $0x124] ss:$12 sps:$4 sm:$0xff]   ;;  %v2111_v38 = vld [vmem:[#allocation2 + $0x80] ss:$12 sps:$4 sm:$0xff]  }
  0x33   :  { %1874 = vmatprep.subr.bf16.mxu1 %v2095_v24  ;;  %v2115_v39 = vld [vmem:[#allocation2 + $0x158] ss:$12 sps:$4 sm:$0xff]   ;;  %v2072_v40 = vld [vmem:[#allocation2 + $0x120] ss:$12 sps:$4 sm:$0xff]   ;;  %v2073_v41 = vld [vmem:[#allocation2 + $0x13c] ss:$12 sps:$4 sm:$0xff]  }
  0x34   :  { %1051 = vmatpush1.bf16.msra.mxu0 %v2045_v7  ;;  %v2116_v42 = vld [vmem:[#allocation2 + $0x98] ss:$12 sps:$4 sm:$0xff]   ;;  %v2120_v43 = vld [vmem:[#allocation2 + $0x170] ss:$12 sps:$4 sm:$0xff]   ;;  %v2076_v45 = vld [vmem:[#allocation2 + $0x154] ss:$12 sps:$4 sm:$0xff]  }
  0x35   :  { %1052 = vmatprep.subr.bf16.mxu0 %v2046_v8  ;;  %v2075_v44 = vld [vmem:[#allocation2 + $0x138] ss:$12 sps:$4 sm:$0xff]   ;;  %v2121_v46 = vld [vmem:[#allocation2 + $0xb0] ss:$12 sps:$4 sm:$0xff]   ;;  %v2125_v47 = vld [vmem:[#allocation2 + $0x248] ss:$12 sps:$4 sm:$0xff]  }
  0x36   :  { %1875 = vmatpush3.bf16.msra.mxu1 %v2096_v25  ;;  %v55_v48 = vld [vmem:[%s2460_s0] sm:$0xff]  ;;  %v2078_v49 = vld [vmem:[#allocation2 + $0x150] ss:$12 sps:$4 sm:$0xff]   ;;  %v2126_v50 = vld [vmem:[#allocation2 + $0x188] ss:$12 sps:$4 sm:$0xff]  }
  0x37   :  { %1876 = vmatprep.subr.bf16.mxu1 %v2100_v28  ;;  %v2079_v51 = vld [vmem:[#allocation2 + $0x16c] ss:$12 sps:$4 sm:$0xff]   ;;  %v61_v52 = vpack.c.bf16 %v55_v48, %v55_v48  ;;  %v2081_v54 = vld [vmem:[#allocation2 + $0x168] ss:$12 sps:$4 sm:$0xff]   ;;  %v2084_v55 = vld [vmem:[#allocation2 + $0x184] ss:$12 sps:$4 sm:$0xff]  }
  0x38   :  { %1053 = vmatpush1.bf16.msra.mxu0 %v2048_v9  ;;  %v2130_v53 = vld [vmem:[#allocation2 + $0x260] ss:$12 sps:$4 sm:$0xff]   ;;  %v2135_v57 = vld [vmem:[#allocation2 + $0x278] ss:$12 sps:$4 sm:$0xff]   ;;  %v2089_v59 = vld [vmem:[#allocation2 + $0x19c] ss:$12 sps:$4 sm:$0xff]  }
  0x39   :  { %1054 = vmatprep.subr.bf16.mxu0 %v2049_v10  ;;  %v2131_v56 = vld [vmem:[#allocation2 + $0x1a0] ss:$12 sps:$4 sm:$0xff]   ;;  %v2136_v60 = vld [vmem:[#allocation2 + $0x1b8] ss:$12 sps:$4 sm:$0xff]   ;;  %v2140_v61 = vld [vmem:[#allocation2 + $0x290] ss:$12 sps:$4 sm:$0xff]  }
  0x3a   :  { %1877 = vmatpush3.bf16.msra.mxu1 %v2101_v29  ;;  %v2082_v58 = vld [vmem:[#allocation2 + $0x180] ss:$12 sps:$4 sm:$0xff]   ;;  %v2087_v62 = vld [vmem:[#allocation2 + $0x198] ss:$12 sps:$4 sm:$0xff]   ;;  %v2141_v0 = vld [vmem:[#allocation2 + $0x1d0] ss:$12 sps:$4 sm:$0xff]  }
  0x3b   :  { %1878 = vmatprep.subr.bf16.mxu1 %v2105_v31  ;;  %v2094_v63 = vld [vmem:[#allocation2 + $0x1b4] ss:$12 sps:$4 sm:$0xff]   ;;  %v2092_v2 = vld [vmem:[#allocation2 + $0x1b0] ss:$12 sps:$4 sm:$0xff]   ;;  %v2099_v3 = vld [vmem:[#allocation2 + $0x1cc] ss:$12 sps:$4 sm:$0xff]  }
  0x3c   :  { %1055 = vmatpush1.bf16.msra.mxu0 %v2051_v11  ;;  %v2145_v1 = vld [vmem:[#allocation2 + $0x2a8] ss:$12 sps:$4 sm:$0xff]   ;;  %v2150_v5 = vld [vmem:[#allocation2 + $0x2c0] ss:$12 sps:$4 sm:$0xff]   ;;  %v58_v8 = vld [vmem:[%s2460_s0 + $0x18] sm:$0xff] }
  0x3d   :  { %1056 = vmatprep.subr.bf16.mxu0 %v2052_v12  ;;  %v2146_v4 = vld [vmem:[#allocation2 + $0x1e8] ss:$12 sps:$4 sm:$0xff]   ;;  %v2151_v7 = vld [vmem:[#allocation2 + $0x200] ss:$12 sps:$4 sm:$0xff]   ;;  %v2104_v9 = vld [vmem:[#allocation2 + $0x1e4] ss:$12 sps:$4 sm:$0xff]   ;;  %v64_v11 = vpack.c.bf16 %v58_v8, %v58_v8 }
  0x3e   :  { %1879 = vmatpush3.bf16.msra.mxu1 %v2106_v34  ;;  %v2097_v6 = vld [vmem:[#allocation2 + $0x1c8] ss:$12 sps:$4 sm:$0xff]   ;;  %v2155_v10 = vld [vmem:[#allocation2 + $0x2d8] ss:$12 sps:$4 sm:$0xff]   ;;  %v2102_v12 = vld [vmem:[#allocation2 + $0x1e0] ss:$12 sps:$4 sm:$0xff]  }
  0x3f   :  { %1880 = vmatprep.subr.bf16.mxu1 %v2110_v35  ;;  %v2156_v13 = vld [vmem:[#allocation2 + $0x218] ss:$12 sps:$4 sm:$0xff]   ;;  %v2160_v15 = vld [vmem:[#allocation2 + $0x2f0] ss:$12 sps:$4 sm:$0xff]   ;;  %v2114_v17 = vld [vmem:[#allocation2 + $0x214] ss:$12 sps:$4 sm:$0xff]  }
  0x40   :  { %1057 = vmatpush1.bf16.msra.mxu0 %v2054_v14  ;;  %v2109_v14 = vld [vmem:[#allocation2 + $0x1fc] ss:$12 sps:$4 sm:$0xff]   ;;  %v57_v21 = vld [vmem:[%s2460_s0 + $0x10] sm:$0xff]  ;;  %v2119_v22 = vld [vmem:[#allocation2 + $0x22c] ss:$12 sps:$4 sm:$0xff]  }
  0x41   :  { %1058 = vmatprep.subr.bf16.mxu0 %v2055_v16  ;;  %v2107_v16 = vld [vmem:[#allocation2 + $0x1f8] ss:$12 sps:$4 sm:$0xff]   ;;  %v2161_v18 = vld [vmem:[#allocation2 + $0x230] ss:$12 sps:$4 sm:$0xff]   ;;  %v2390_v24 = vpack.c.bf16 %v57_v21, %v57_v21  ;;  %v2170_v25 = vld [vmem:[#allocation2 + $0x3e0] ss:$12 sps:$4 sm:$0xff]  }
  0x42   :  { %1881 = vmatpush3.bf16.msra.mxu1 %v2111_v38  ;;  %v2171_v28 = vld [vmem:[#allocation2 + $0x320] ss:$12 sps:$4 sm:$0xff]   ;;  %v2175_v29 = vld [vmem:[#allocation2 + $0x3f8] ss:$12 sps:$4 sm:$0xff]   ;;  %v2129_v31 = vld [vmem:[#allocation2 + $0x25c] ss:$12 sps:$4 sm:$0xff]  }
  0x43   :  { %1882 = vmatprep.subr.bf16.mxu1 %v2115_v39  ;;  %v2127_v34 = vld [vmem:[#allocation2 + $0x258] ss:$12 sps:$4 sm:$0xff]   ;;  %v2181_v35 = vld [vmem:[#allocation2 + $0x350] ss:$12 sps:$4 sm:$0xff]   ;;  %v2142_v48 = vld [vmem:[#allocation2 + $0x2a0] ss:$12 sps:$4 sm:$0xff]  }
  0x44   :  { %1059 = vmatpush1.bf16.msra.mxu0 %v2057_v19  ;;  %v2165_v19 = vld [vmem:[#allocation2 + $0x3c8] ss:$12 sps:$4 sm:$0xff]   ;;  %v2132_v38 = vld [vmem:[#allocation2 + $0x270] ss:$12 sps:$4 sm:$0xff]   ;;  %v2139_v39 = vld [vmem:[#allocation2 + $0x28c] ss:$12 sps:$4 sm:$0xff]  }
  0x45   :  { %1060 = vmatprep.subr.bf16.mxu0 %v2058_v20  ;;  %v2112_v20 = vld [vmem:[#allocation2 + $0x210] ss:$12 sps:$4 sm:$0xff]   ;;  %v2194_v8 = vld [vmem:[#allocation2 + $0x394] ss:$12 sps:$4 sm:$0xff]  }
  0x46   :  { %1883 = vmatpush3.bf16.msra.mxu1 %v2116_v42  ;;  %v60_v42 = vld [vmem:[%s2460_s0 + $0x28] sm:$0xff] }
  0x47   :  { %1884 = vmatprep.subr.bf16.mxu1 %v2120_v43  ;;  %v66_v43 = vpack.c.bf16 %v60_v42, %v60_v42  ;;  %v2214_v21 = vld [vmem:[#allocation2 + $0x420] ss:$12 sps:$4 sm:$0xff]  }
  0x48   :  { %1061 = vmatpush1.bf16.msra.mxu0 %v2060_v23  ;;  %v2166_v23 = vld [vmem:[#allocation2 + $0x308] ss:$12 sps:$4 sm:$0xff]  }
  0x49   :  { %1062 = vmatprep.subr.bf16.mxu0 %v2061_v26  ;;  %v2117_v26 = vld [vmem:[#allocation2 + $0x228] ss:$12 sps:$4 sm:$0xff]  }
  0x4a   :  { %1885 = vmatpush3.bf16.msra.mxu1 %v2121_v46  ;;  %v2144_v46 = vld [vmem:[#allocation2 + $0x2a4] ss:$12 sps:$4 sm:$0xff]  }
  0x4b   :  { %1892 = vmatprep.subr.bf16.mxu1 %v2125_v47  ;;  %v2195_v47 = vld [vmem:[#allocation2 + $0x458] ss:$12 sps:$4 sm:$0xff]  }
  0x4c   :  { %1063 = vmatpush1.bf16.msra.mxu0 %v2063_v27  ;;  %v2124_v27 = vld [vmem:[#allocation2 + $0x244] ss:$12 sps:$4 sm:$0xff]  }
  0x4d   :  { %1064 = vmatprep.subr.bf16.mxu0 %v2064_v30  ;;  %1200 = vmatmul.mubr.bf16.vlgmr.msra.gmra.mrb[0].mxu1 %v61_v52  ;;  %v2122_v30 = vld [vmem:[#allocation2 + $0x240] ss:$12 sps:$4 sm:$0xff]  }
  0x4e   :  { %1893 = vmatpush3.bf16.msra.mxu1 %v2126_v50  ;;  %1239 = vmatprep.mubr.bf16.mxu1 %v64_v11  ;;  %v2149_v50 = vld [vmem:[#allocation2 + $0x2bc] ss:$12 sps:$4 sm:$0xff]  }
  0x4f   :  { %1894 = vmatprep.subr.bf16.mxu1 %v2130_v53  ;;  %v2201_v53 = vld [vmem:[#allocation2 + $0x3b0] ss:$12 sps:$4 sm:$0xff]  }
  0x50   :  { %1065 = vmatpush1.bf16.msra.mxu0 %v2066_v32  ;;  %v2176_v32 = vld [vmem:[#allocation2 + $0x338] ss:$12 sps:$4 sm:$0xff]  }
  0x51   :  { %1066 = vmatprep.subr.bf16.mxu0 %v2067_v33  ;;  %v2180_v33 = vld [vmem:[#allocation2 + $0x410] ss:$12 sps:$4 sm:$0xff]  }
  0x52   :  { %1895 = vmatpush3.bf16.msra.mxu1 %v2131_v56  ;;  %v2152_v56 = vld [vmem:[#allocation2 + $0x2d0] ss:$12 sps:$4 sm:$0xff]  }
  0x53   :  { %1896 = vmatprep.subr.bf16.mxu1 %v2135_v57  ;;  %v2159_v57 = vld [vmem:[#allocation2 + $0x2ec] ss:$12 sps:$4 sm:$0xff]  }
  0x54   :  { %1067 = vmatpush1.bf16.msra.mxu0 %v2069_v36  ;;  %v2134_v36 = vld [vmem:[#allocation2 + $0x274] ss:$12 sps:$4 sm:$0xff]  }
  0x55   :  { %1068 = vmatprep.subr.bf16.mxu0 %v2070_v37  ;;  %v2185_v37 = vld [vmem:[#allocation2 + $0x428] ss:$12 sps:$4 sm:$0xff]  }
  0x56   :  { %1897 = vmatpush3.bf16.msra.mxu1 %v2136_v60  ;;  %v2164_v60 = vld [vmem:[#allocation2 + $0x304] ss:$12 sps:$4 sm:$0xff]  }
  0x57   :  { %1898 = vmatprep.subr.bf16.mxu1 %v2140_v61  ;;  %v2162_v61 = vld [vmem:[#allocation2 + $0x300] ss:$12 sps:$4 sm:$0xff]  }
  0x58   :  { %1069 = vmatpush1.bf16.msra.mxu0 %v2072_v40  ;;  %v2186_v40 = vld [vmem:[#allocation2 + $0x368] ss:$12 sps:$4 sm:$0xff]  }
  0x59   :  { %1070 = vmatprep.subr.bf16.mxu0 %v2073_v41  ;;  %v2190_v41 = vld [vmem:[#allocation2 + $0x440] ss:$12 sps:$4 sm:$0xff]  }
  0x5a   :  { %1899 = vmatpush3.bf16.msra.mxu1 %v2141_v0  ;;  %v2174_v0 = vld [vmem:[#allocation2 + $0x334] ss:$12 sps:$4 sm:$0xff]  }
  0x5b   :  { %1900 = vmatprep.subr.bf16.mxu1 %v2145_v1  ;;  %v2172_v1 = vld [vmem:[#allocation2 + $0x330] ss:$12 sps:$4 sm:$0xff]  }
  0x5c   :  { %1071 = vmatpush1.bf16.msra.mxu0 %v2075_v44  ;;  %v2137_v44 = vld [vmem:[#allocation2 + $0x288] ss:$12 sps:$4 sm:$0xff]  }
  0x5d   :  { %1072 = vmatprep.subr.bf16.mxu0 %v2076_v45  ;;  %v2191_v45 = vld [vmem:[#allocation2 + $0x380] ss:$12 sps:$4 sm:$0xff]  }
  0x5e   :  { %1901 = vmatpush3.bf16.msra.mxu1 %v2146_v4  ;;  %v2184_v4 = vld [vmem:[#allocation2 + $0x364] ss:$12 sps:$4 sm:$0xff]  }
  0x5f   :  { %1902 = vmatprep.subr.bf16.mxu1 %v2150_v5  ;;  %v2182_v5 = vld [vmem:[#allocation2 + $0x360] ss:$12 sps:$4 sm:$0xff]  }
  0x60   :  { %1073 = vmatpush1.bf16.msra.mxu0 %v2078_v49  ;;  %v2196_v49 = vld [vmem:[#allocation2 + $0x398] ss:$12 sps:$4 sm:$0xff]  }
  0x61   :  { %1074 = vmatprep.subr.bf16.mxu0 %v2079_v51  ;;  %v2200_v51 = vld [vmem:[#allocation2 + $0x470] ss:$12 sps:$4 sm:$0xff]  }
  0x62   :  { %1903 = vmatpush3.bf16.msra.mxu1 %v2151_v7  ;;  %v2187_v7 = vld [vmem:[#allocation2 + $0x378] ss:$12 sps:$4 sm:$0xff]  }
  0x63   :  { %1904 = vmatprep.subr.bf16.mxu1 %v2155_v10  ;;  %v2199_v10 = vld [vmem:[#allocation2 + $0x3ac] ss:$12 sps:$4 sm:$0xff]  }
  0x64   :  { %1075 = vmatpush1.bf16.msra.mxu0 %v2081_v54  ;;  %v59_v54 = vld [vmem:[%s2460_s0 + $0x20] sm:$0xff] }
  0x65   :  { %1085 = vmatprep.subr.bf16.mxu0 %v2084_v55  ;;  %v2154_v55 = vld [vmem:[#allocation2 + $0x2d4] ss:$12 sps:$4 sm:$0xff]  }
  0x66   :  { %1905 = vmatpush3.bf16.msra.mxu1 %v2156_v13  ;;  %v2202_v13 = vld [vmem:[#allocation2 + $0x3c0] ss:$12 sps:$4 sm:$0xff]  }
  0x67   :  { %1077 = vmatmul.mubr.bf16.vlgmr.msra.gmra.mrb[0].mxu0 %v61_v52  ;;  %1906 = vmatprep.subr.bf16.mxu1 %v2160_v15  ;;  %v2147_v52 = vld [vmem:[#allocation2 + $0x2b8] ss:$12 sps:$4 sm:$0xff]  }
  0x68   :  { %1086 = vmatpush1.bf16.msra.mxu0 %v2082_v58  ;;  %1117 = vmatprep.mubr.bf16.mxu0 %v64_v11  ;;  %v2399_v58 = vpack.c.bf16 %v59_v54, %v59_v54  ;;  %v2197_v11 = vld [vmem:[#allocation2 + $0x3a8] ss:$12 sps:$4 sm:$0xff]   ;;  %v2205_v15 = vld [vmem:[#allocation2 + $0x3d8] ss:$12 sps:$4 sm:$0xff]  }
  0x69   :  { %1087 = vmatprep.subr.bf16.mxu0 %v2089_v59  ;;  %v2157_v59 = vld [vmem:[#allocation2 + $0x2e8] ss:$12 sps:$4 sm:$0xff]  }
  0x6a   :  { %1907 = vmatpush3.bf16.msra.mxu1 %v2161_v18  ;;  %v2213_v18 = vld [vmem:[#allocation2 + $0x40c] ss:$12 sps:$4 sm:$0xff]  }
  0x6b   :  { %1914 = vmatprep.subr.bf16.mxu1 %v2165_v19  ;;  %v2211_v19 = vld [vmem:[#allocation2 + $0x408] ss:$12 sps:$4 sm:$0xff]  }
  0x6c   :  { %1088 = vmatpush1.bf16.msra.mxu0 %v2087_v62  ;;  %v2169_v62 = vld [vmem:[#allocation2 + $0x31c] ss:$12 sps:$4 sm:$0xff]  }
  0x6d   :  { %1089 = vmatprep.subr.bf16.mxu0 %v2094_v63  ;;  %1240 = vmatmul.mubr.bf16.vlgmr.msra.gmra.mrb[4].mxu1 %v2390_v24  ;;  %v2167_v63 = vld [vmem:[#allocation2 + $0x318] ss:$12 sps:$4 sm:$0xff]  }
  0x6e   :  { %1915 = vmatpush3.bf16.msra.mxu1 %v2166_v23  ;;  %1279 = vmatprep.mubr.bf16.mxu1 %v66_v43  ;;  %v2217_v23 = vld [vmem:[#allocation2 + $0x438] ss:$12 sps:$4 sm:$0xff]  }
  0x6f   :  { %1916 = vmatprep.subr.bf16.mxu1 %v2170_v25  ;;  %v2220_v25 = vld [vmem:[#allocation2 + $0x450] ss:$12 sps:$4 sm:$0xff]  }
  0x70   :  { %1090 = vmatpush1.bf16.msra.mxu0 %v2092_v2  ;;  %v2179_v2 = vld [vmem:[#allocation2 + $0x34c] ss:$12 sps:$4 sm:$0xff]  }
  0x71   :  { %1091 = vmatprep.subr.bf16.mxu0 %v2099_v3  ;;  %v2177_v3 = vld [vmem:[#allocation2 + $0x348] ss:$12 sps:$4 sm:$0xff]  }
  0x72   :  { %1917 = vmatpush3.bf16.msra.mxu1 %v2171_v28  ;;  %v2226_v28 = vld [vmem:[#allocation4 + $0x40] sm:$0xff]  }
  0x73   :  { %1918 = vmatprep.subr.bf16.mxu1 %v2175_v29  ;;  %v2227_v29 = vld [vmem:[#allocation4] sm:$0xff]  }
  0x74   :  { %1092 = vmatpush1.bf16.msra.mxu0 %v2097_v6  ;;  %v2189_v6 = vld [vmem:[#allocation2 + $0x37c] ss:$12 sps:$4 sm:$0xff]  }
  0x75   :  { %1093 = vmatprep.subr.bf16.mxu0 %v2104_v9  ;;  %v2192_v9 = vld [vmem:[#allocation2 + $0x390] ss:$12 sps:$4 sm:$0xff]  }
  0x76   :  { %1919 = vmatpush3.bf16.msra.mxu1 %v2176_v32  ;;  %v2230_v32 = vld [vmem:[#allocation4 + $0x50] sm:$0xff]  }
  0x77   :  { %1920 = vmatprep.subr.bf16.mxu1 %v2180_v33  ;;  %v2231_v33 = vld [vmem:[#allocation4 + $0x10] sm:$0xff]  }
  0x78   :  { %1094 = vmatpush1.bf16.msra.mxu0 %v2102_v12  ;;  %v2204_v12 = vld [vmem:[#allocation2 + $0x3c4] ss:$12 sps:$4 sm:$0xff]  }
  0x79   :  { %1095 = vmatprep.subr.bf16.mxu0 %v2109_v14  ;;  %v2207_v14 = vld [vmem:[#allocation2 + $0x3dc] ss:$12 sps:$4 sm:$0xff]  }
  0x7a   :  { %1921 = vmatpush3.bf16.msra.mxu1 %v2181_v35  ;;  %v2233_v35 = vld [vmem:[#allocation4 + $0x18] sm:$0xff]  }
  0x7b   :  { %1922 = vmatprep.subr.bf16.mxu1 %v2185_v37  ;;  %v2235_v37 = vld [vmem:[#allocation4 + $0x20] sm:$0xff]  }
  0x7c   :  { %1096 = vmatpush1.bf16.msra.mxu0 %v2107_v16  ;;  %v2210_v16 = vld [vmem:[#allocation2 + $0x3f4] ss:$12 sps:$4 sm:$0xff]  }
  0x7d   :  { %1097 = vmatprep.subr.bf16.mxu0 %v2114_v17  ;;  %v2208_v17 = vld [vmem:[#allocation2 + $0x3f0] ss:$12 sps:$4 sm:$0xff]  }
  0x7e   :  { %1923 = vmatpush3.bf16.msra.mxu1 %v2186_v40 }
  0x7f   :  { %1924 = vmatprep.subr.bf16.mxu1 %v2190_v41 }
  0x80   :  { %1098 = vmatpush1.bf16.msra.mxu0 %v2112_v20  ;;  %v2216_v20 = vld [vmem:[#allocation2 + $0x424] ss:$12 sps:$4 sm:$0xff]  }
  0x81   :  { %1099 = vmatprep.subr.bf16.mxu0 %v2119_v22  ;;  %v2219_v22 = vld [vmem:[#allocation2 + $0x43c] ss:$12 sps:$4 sm:$0xff]  }
  0x82   :  { %1925 = vmatpush3.bf16.msra.mxu1 %v2191_v45  ;;  %v2238_v45 = vld [vmem:[#allocation4 + $0x70] sm:$0xff]  }
  0x83   :  { %1926 = vmatprep.subr.bf16.mxu1 %v2195_v47  ;;  %v2240_v47 = vld [vmem:[#allocation4 + $0x78] sm:$0xff]  }
  0x84   :  { %1100 = vmatpush1.bf16.msra.mxu0 %v2117_v26  ;;  %v2225_v26 = vld [vmem:[#allocation2 + $0x46c] ss:$12 sps:$4 sm:$0xff]  }
  0x85   :  { %1101 = vmatprep.subr.bf16.mxu0 %v2124_v27  ;;  %v2223_v27 = vld [vmem:[#allocation2 + $0x468] ss:$12 sps:$4 sm:$0xff]  }
  0x86   :  { %1927 = vmatpush3.bf16.msra.mxu1 %v2196_v49  ;;  %v261_v49 = vlaneseq }
  0x87   :  { %1928 = vmatprep.subr.bf16.mxu1 %v2200_v51 }
  0x88   :  { %1102 = vmatpush1.bf16.msra.mxu0 %v2122_v30  ;;  %v2228_v30 = vld [vmem:[#allocation4 + $0x48] sm:$0xff]   ;;  %v262_v51 = vshrl.u32 %v261_v49, 7 }
  0x89   :  { %1103 = vmatprep.subr.bf16.mxu0 %v2129_v31  ;;  %v2229_v31 = vld [vmem:[#allocation4 + $0x8] sm:$0xff]  }
  0x8a   :  { %1929 = vmatpush3.bf16.msra.mxu1 %v2201_v53  ;;  %v259_v53 = vld [vmem:[%s2462_s2] sm:$0x7] }
  0x8b   :  { %1936 = vmatprep.subr.bf16.mxu1 %v2226_v28  ;;  %v2250_v28 = vld [vmem:[%s2465_s5] sm:$0xff]  }
  0x8c   :  { %1104 = vmatpush1.bf16.msra.mxu0 %v2127_v34  ;;  %v2232_v34 = vld [vmem:[#allocation4 + $0x58] sm:$0xff]  }
  0x8d   :  { %1105 = vmatprep.subr.bf16.mxu0 %v2134_v36  ;;  %1280 = vmatmul.mubr.bf16.vlgmr.msra.gmra.mrb[8].mxu1 %v2399_v58  ;;  %v2234_v36 = vld [vmem:[#allocation4 + $0x60] sm:$0xff]  }
  0x8e   :  { %1937 = vmatpush3.bf16.msra.mxu1 %v2227_v29  ;;  %v2251_v29 = vld [vmem:[%s2465_s5 + $0x8] sm:$0xff]  }
  0x8f   :  { %1938 = vmatprep.subr.bf16.mxu1 %v2228_v30  ;;  %v2252_v30 = vld [vmem:[%s2465_s5 + $0x10] sm:$0xff]  }
  0x90   :  { %1106 = vmatpush1.bf16.msra.mxu0 %v2132_v38  ;;  %v2236_v38 = vld [vmem:[#allocation4 + $0x68] sm:$0xff]  }
  0x91   :  { %1107 = vmatprep.subr.bf16.mxu0 %v2139_v39  ;;  %v2237_v39 = vld [vmem:[#allocation4 + $0x28] sm:$0xff]  }
  0x92   :  { %1939 = vmatpush3.bf16.msra.mxu1 %v2229_v31  ;;  %v2253_v31 = vld [vmem:[%s2465_s5 + $0x18] sm:$0xff]  }
  0x93   :  { %1940 = vmatprep.subr.bf16.mxu1 %v2230_v32  ;;  %v2254_v32 = vld [vmem:[%s2465_s5 + $0x20] sm:$0xff]  }
  0x94   :  { %1108 = vmatpush1.bf16.msra.mxu0 %v2137_v44 }
  0x95   :  { %1109 = vmatprep.subr.bf16.mxu0 %v2144_v46  ;;  %v2239_v46 = vld [vmem:[#allocation4 + $0x30] sm:$0xff]  }
  0x96   :  { %1941 = vmatpush3.bf16.msra.mxu1 %v2231_v33  ;;  %v2255_v33 = vld [vmem:[%s2465_s5 + $0x28] sm:$0xff]  }
  0x97   :  { %1942 = vmatprep.subr.bf16.mxu1 %v2232_v34  ;;  %v2256_v34 = vld [vmem:[%s2465_s5 + $0x30] sm:$0xff]  }
  0x98   :  { %1110 = vmatpush1.bf16.msra.mxu0 %v2142_v48  ;;  %v2241_v48 = vld [vmem:[#allocation4 + $0x38] sm:$0xff]  }
  0x99   :  { %1111 = vmatprep.subr.bf16.mxu0 %v2149_v50  ;;  %v2312_v50 = vmov 0.0  }
  0x9a   :  { %1943 = vmatpush3.bf16.msra.mxu1 %v2233_v35  ;;  %v2257_v35 = vld [vmem:[%s2465_s5 + $0x38] sm:$0xff]  }
  0x9b   :  { %1944 = vmatprep.subr.bf16.mxu1 %v2234_v36 }
  0x9c   :  { %1112 = vmatpush1.bf16.msra.mxu0 %v2147_v52  ;;  %v271_v52 = vsub.s32 2, %v262_v51 }
  0x9d   :  { %1113 = vmatprep.subr.bf16.mxu0 %v2154_v55 }
  0x9e   :  { %1945 = vmatpush3.bf16.msra.mxu1 %v2235_v37  ;;  %v272_v54 = vrot.slane %v259_v53, %v271_v52 }
  0x9f   :  { %1946 = vmatprep.subr.bf16.mxu1 %v2236_v38 }
  0xa0   :  { %1114 = vmatpush1.bf16.msra.mxu0 %v2152_v56 }
  0xa1   :  { %1115 = vmatprep.subr.bf16.mxu0 %v2159_v57 }
  0xa2   :  { %1947 = vmatpush3.bf16.msra.mxu1 %v2237_v39 }
  0xa3   :  { %1948 = vmatprep.subr.bf16.mxu1 %v2238_v45 }
  0xa4   :  { %1116 = vmatpush1.bf16.msra.mxu0 %v2157_v59 }
  0xa5   :  { %1126 = vmatprep.subr.bf16.mxu0 %v2164_v60 }
  0xa6   :  { %1949 = vmatpush3.bf16.msra.mxu1 %v2239_v46 }
  0xa7   :  { %1118 = vmatmul.mubr.bf16.vlgmr.msra.gmra.mrb[0].mxu0 %v2390_v24  ;;  %v2222_v24 = vld [vmem:[#allocation2 + $0x454] ss:$12 sps:$4 sm:$0xff]   ;;  %1950 = vmatprep.subr.bf16.mxu1 %v2240_v47 }
  0xa8   :  { %1127 = vmatpush1.bf16.msra.mxu0 %v2162_v61  ;;  %1158 = vmatprep.mubr.bf16.mxu0 %v66_v43 }
  0xa9   :  { %1128 = vmatprep.subr.bf16.mxu0 %v2169_v62 }
  0xaa   :  { %1951 = vmatpush3.bf16.msra.mxu1 %v2241_v48 }
  0xab   :  { %1976 = vmatprep.subr.bf16.mxu1 %v2312_v50 }
  0xac   :  { %1129 = vmatpush1.bf16.msra.mxu0 %v2167_v63 }
  0xad   :  { %1130 = vmatprep.subr.bf16.mxu0 %v2174_v0 }
  0xb0   :  { %1131 = vmatpush1.bf16.msra.mxu0 %v2172_v1 }
  0xb1   :  { %1132 = vmatprep.subr.bf16.mxu0 %v2179_v2 }
  0xb4   :  { %1133 = vmatpush1.bf16.msra.mxu0 %v2177_v3 }
  0xb5   :  { %1134 = vmatprep.subr.bf16.mxu0 %v2184_v4  ;;  %v263_v4 = vsub.s32 0, %v262_v51 }
  0xb8   :  { %1135 = vmatpush1.bf16.msra.mxu0 %v2182_v5  ;;  %v267_v5 = vsub.s32 1, %v262_v51 }
  0xb9   :  { %1136 = vmatprep.subr.bf16.mxu0 %v2189_v6  ;;  %v264_v6 = vrot.slane %v259_v53, %v263_v4 }
  0xbc   :  { %1137 = vmatpush1.bf16.msra.mxu0 %v2187_v7  ;;  %v268_v7 = vrot.slane %v259_v53, %v267_v5 }
  0xbd   :  { %1138 = vmatprep.subr.bf16.mxu0 %v2194_v8 }
  0xc0   :  { %1139 = vmatpush1.bf16.msra.mxu0 %v2192_v9 }
  0xc1   :  { %1140 = vmatprep.subr.bf16.mxu0 %v2199_v10 }
  0xc4   :  { %1141 = vmatpush1.bf16.msra.mxu0 %v2197_v11 }
  0xc5   :  { %1142 = vmatprep.subr.bf16.mxu0 %v2204_v12 }
  0xc8   :  { %1143 = vmatpush1.bf16.msra.mxu0 %v2202_v13 }
  0xc9   :  { %1144 = vmatprep.subr.bf16.mxu0 %v2207_v14 }
  0xcc   :  { %1145 = vmatpush1.bf16.msra.mxu0 %v2205_v15 }
  0xcd   :  { %1146 = vmatprep.subr.bf16.mxu0 %v2210_v16 }
  0xd0   :  { %1147 = vmatpush1.bf16.msra.mxu0 %v2208_v17  ;;  %v2242_v17 = vld [vmem:[#allocation4 + $0x80] sm:$0xff]  }
  0xd1   :  { %1148 = vmatprep.subr.bf16.mxu0 %v2213_v18 }
  0xd4   :  { %1149 = vmatpush1.bf16.msra.mxu0 %v2211_v19  ;;  %v2243_v19 = vld [vmem:[#allocation4 + $0x88] sm:$0xff]  }
  0xd5   :  { %1150 = vmatprep.subr.bf16.mxu0 %v2216_v20  ;;  %v2244_v20 = vld [vmem:[#allocation4 + $0x90] sm:$0xff]  }
  0xd8   :  { %1151 = vmatpush1.bf16.msra.mxu0 %v2214_v21  ;;  %v2245_v21 = vld [vmem:[#allocation4 + $0x98] sm:$0xff]  }
  0xd9   :  { %1152 = vmatprep.subr.bf16.mxu0 %v2219_v22  ;;  %v2246_v22 = vld [vmem:[#allocation4 + $0xa0] sm:$0xff]  }
  0xdc   :  { %1153 = vmatpush1.bf16.msra.mxu0 %v2217_v23  ;;  %v2247_v23 = vld [vmem:[#allocation4 + $0xa8] sm:$0xff]  }
  0xdd   :  { %1154 = vmatprep.subr.bf16.mxu0 %v2222_v24  ;;  %v2248_v24 = vld [vmem:[#allocation4 + $0xb0] sm:$0xff]  }
  0xe0   :  { %1155 = vmatpush1.bf16.msra.mxu0 %v2220_v25  ;;  %v2249_v25 = vld [vmem:[#allocation4 + $0xb8] sm:$0xff]  }
  0xe1   :  { %1156 = vmatprep.subr.bf16.mxu0 %v2225_v26 }
  0xe4   :  { %1157 = vmatpush1.bf16.msra.mxu0 %v2223_v27 }
  0xe7   :  { %1159 = vmatmul.mubr.bf16.vlgmr.msra.gmra.mrb[0].mxu0 %v2399_v58 }
 0x120   :  { %v1886_v40 = vpop.f32.mrb[0].mxu1 }
 0x121   :  { %v1887_v41 = vpop.f32.mrb[1].mxu1 }
 0x122   :  { %v1888_v42 = vadd.f32 %v1887_v41, %v1886_v40  ;;  %v1889_v43 = vpop.f32.mrb[2].mxu1  ;;  %v1836_v41 = vld [vmem:[%s2464_s4] ss:$0 sm:$0xff] }
 0x123   :  { %v1890_v44 = vpop.f32.mrb[3].mxu1 }
 0x124   :  { %v1202_v55 = vadd.f32 %v1888_v42, %v272_v54 }
 0x140   :  { %v1908_v56 = vpop.f32.mrb[4].mxu1 }
 0x141   :  { %v1909_v57 = vpop.f32.mrb[5].mxu1 }
 0x142   :  { %v1910_v58 = vadd.f32 %v1909_v57, %v1908_v56  ;;  %v1911_v59 = vpop.f32.mrb[6].mxu1 }
 0x143   :  { %v1912_v60 = vpop.f32.mrb[7].mxu1 }
 0x144   :  { %v1242_v61 = vadd.f32 %v1910_v58, %v1202_v55 }
 0x160   :  { %v1930_v62 = vpop.f32.mrb[8].mxu1 }
 0x161   :  { %v1931_v63 = vpop.f32.mrb[9].mxu1 }
 0x162   :  { %v1932_v0 = vadd.f32 %v1931_v63, %v1930_v62  ;;  %v1933_v1 = vpop.f32.mrb[10].mxu1 }
 0x163   :  { %v1934_v2 = vpop.f32.mrb[11].mxu1 }
 0x164   :  { %v1282_v3 = vadd.f32 %v1932_v0, %v1242_v61 }
 0x166   :  { %v1289_v26 = vmax.f32 %v1282_v3, 0.0 }
 0x168   :  { %v1292_v27 = vpack.c.bf16 %v1289_v26, %v1289_v26 }
 0x1ba   :  { %v1160_v8 = vpop.f32.mrb[0].mxu0 }
 0x1bb   :  { %v2016_v9 = vadd.f32 %v1160_v8, %v264_v6  ;;  %v1162_v10 = vpop.f32.mrb[1].mxu0 }
 0x1bc   :  { %v2017_v11 = vadd.f32 %v1162_v10, %v268_v7  ;;  %v1164_v12 = vpop.f32.mrb[2].mxu0 }
 0x1bd   :  { %v1287_v13 = vmax.f32 %v2016_v9, 0.0  ;;  %v1165_v14 = vpop.f32.mrb[3].mxu0 }
 0x1be   :  { %v1288_v15 = vmax.f32 %v2017_v11, 0.0 }
 0x1bf   :  { %v1290_v18 = vpack.c.bf16 %v1287_v13, %v1287_v13 }
 0x1c0   :  { %v1291_v16 = vpack.c.bf16 %v1288_v15, %v1288_v15 }
 0x1c2   :  { %1524 = vmatprep.mubr.bf16.mxu1 %v1291_v16 }
 0x1c3   :  { %1525 = vmatmul.mubr.bf16.vlgmr.msra.gmra.mrb[12].mxu1 %v1290_v18 }
 0x1c4   :  { %1977 = vmatpush3.bf16.msra.mxu1 %v2242_v17  ;;  %1992 = vmatprep.mubr.msk.bf16.mxu1 %vm2313_vm0, %v2312_v50 }
 0x1c5   :  { %1978 = vmatprep.subr.bf16.mxu1 %v2312_v50 }
 0x1c8   :  { %1979 = vmatpush3.bf16.msra.mxu1 %v2243_v19 }
 0x1c9   :  { %1980 = vmatprep.subr.bf16.mxu1 %v2312_v50 }
 0x1cc   :  { %1981 = vmatpush3.bf16.msra.mxu1 %v2244_v20 }
 0x1cd   :  { %1982 = vmatprep.subr.bf16.mxu1 %v2312_v50 }
 0x1d0   :  { %1983 = vmatpush3.bf16.msra.mxu1 %v2245_v21 }
 0x1d1   :  { %1984 = vmatprep.subr.bf16.mxu1 %v2312_v50 }
 0x1d4   :  { %1985 = vmatpush3.bf16.msra.mxu1 %v2246_v22 }
 0x1d5   :  { %1986 = vmatprep.subr.bf16.mxu1 %v2312_v50 }
 0x1d8   :  { %1987 = vmatpush3.bf16.msra.mxu1 %v2247_v23 }
 0x1d9   :  { %1988 = vmatprep.subr.bf16.mxu1 %v2312_v50 }
 0x1dc   :  { %1989 = vmatpush3.bf16.msra.mxu1 %v2248_v24 }
 0x1dd   :  { %1990 = vmatprep.subr.bf16.mxu1 %v2312_v50 }
 0x1e0   :  { %1991 = vmatpush3.bf16.msra.mxu1 %v2249_v25 }
 0x1e1   :  { %1996 = vmatprep.subr.bf16.mxu1 %v2312_v50 }
 0x1e3   :  { %1993 = vmatmul.mubr.bf16.vlgmr.msra.gmra.mrb[16].mxu1 %v1292_v27 }
 0x1e4   :  { %2012 = vmatprep.mubr.msk.bf16.mxu1 %vm2313_vm0, %v2312_v50  ;;  %1997 = vmatpush3.bf16.msra.mxu1 %v2250_v28 }
 0x1e5   :  { %1998 = vmatprep.subr.bf16.mxu1 %v2312_v50 }
 0x1e8   :  { %1999 = vmatpush3.bf16.msra.mxu1 %v2251_v29 }
 0x1e9   :  { %2000 = vmatprep.subr.bf16.mxu1 %v2312_v50 }
 0x1ec   :  { %2001 = vmatpush3.bf16.msra.mxu1 %v2252_v30 }
 0x1ed   :  { %2002 = vmatprep.subr.bf16.mxu1 %v2312_v50 }
 0x1f0   :  { %2003 = vmatpush3.bf16.msra.mxu1 %v2253_v31 }
 0x1f1   :  { %2004 = vmatprep.subr.bf16.mxu1 %v2312_v50 }
 0x1f4   :  { %2005 = vmatpush3.bf16.msra.mxu1 %v2254_v32 }
 0x1f5   :  { %2006 = vmatprep.subr.bf16.mxu1 %v2312_v50 }
 0x1f8   :  { %2007 = vmatpush3.bf16.msra.mxu1 %v2255_v33 }
 0x1f9   :  { %2008 = vmatprep.subr.bf16.mxu1 %v2312_v50 }
 0x1fc   :  { %2009 = vmatpush3.bf16.msra.mxu1 %v2256_v34 }
 0x1fd   :  { %2010 = vmatprep.subr.bf16.mxu1 %v2312_v50  ;;  %v1861_v50 = vld [vmem:[%s2466_s6] ss:$0 sm:$0xff] }
 0x200   :  { %2011 = vmatpush3.bf16.msra.mxu1 %v2257_v35 }
 0x296   :  { %v1952_v36 = vpop.f32.mrb[12].mxu1 }
 0x297   :  { %v1953_v37 = vpop.f32.mrb[13].mxu1 }
 0x298   :  { %v1954_v38 = vadd.f32 %v1953_v37, %v1952_v36  ;;  %v1955_v39 = vpop.f32.mrb[14].mxu1 }
 0x299   :  { %v1956_v40 = vpop.f32.mrb[15].mxu1 }
 0x29a   :  { %v1527_v42 = vadd.f32 %v1954_v38, %v1836_v41 }
 0x2b6   :  { %v1566_v43 = vpop.f32.mrb[16].mxu1 }
 0x2b7   :  { %v1567_v44 = vadd.f32 %v1566_v43, %v1527_v42  ;;  %v1994_v45 = vpop.f32.mrb[17].mxu1 }
 0x2b8   :  { %v1569_v46 = vpop.f32.mrb[18].mxu1 }
 0x2b9   :  { %v1572_v47 = vmax.f32 %v1567_v44, 0.0  ;;  %v1995_v48 = vpop.f32.mrb[19].mxu1 }
 0x2bb   :  { %v1573_v49 = vpack.c.bf16 %v1572_v47, %v1572_v47 }
 0x2bd   :  { %2013 = vmatmul.mubr.bf16.vlgmr.msra.gmra.mrb[20].mxu1 %v1573_v49 }
 0x390   :  { %v1679_v51 = vpop.f32.mrb[20].mxu1 }
 0x391   :  { %v1680_v52 = vadd.f32 %v1861_v50, %v1679_v51  ;;  %v2014_v53 = vpop.f32.mrb[21].mxu1 }
 0x392   :  { %v1682_v54 = vpop.f32.mrb[22].mxu1 }
 0x393   :  { %1685 = vst [vmem:[%s2467_s7] sm:$0xff] %v1680_v52  ;;  %v2015_v55 = vpop.f32.mrb[23].mxu1 }
 0x394   :  { %1690 = vsyncpa [#allocation3], 1 }
 0x395   :  { %1691 = vsyncpa [#allocation5], 1 }

</bundles_post_ra>
